<compile_context>
chip_gen: v7x
topology: tpu7x:2x2x1
jax: 0.10.0
libtpu: 0.0.40
codegen_flags: <defaults>
</compile_context>

<pallas_src>
import functools

import jax
import jax.numpy as jnp
from jax.experimental import pallas as pl
from jax.experimental.pallas import tpu as pltpu


def _round_up(n, m):
    return ((n + m - 1) // m) * m


def policy_net_kernel(x_ref, w1_ref, b1_ref, w2_ref, b2_ref, w3_ref, b3_ref,
                      o_ref, *, out_size, approx_recip):
    # x is f32 in HBM/VMEM; cast to the MXU dtype on the VPU (free filler).
    x = x_ref[...].astype(w1_ref.dtype)
    # fc1 + ReLU (f32 accumulation, f32 elementwise tail)
    h1 = jnp.dot(x, w1_ref[...], preferred_element_type=jnp.float32)
    h1 = jnp.maximum(h1 + b1_ref[...], 0.0)
    # fc2 + ReLU
    h2 = jnp.dot(h1.astype(w2_ref.dtype), w2_ref[...],
                 preferred_element_type=jnp.float32)
    h2 = jnp.maximum(h2 + b2_ref[...], 0.0)
    # fc3 + ReLU (output columns zero-padded to a lane-dense multiple of 128)
    logits = jnp.dot(h2.astype(w3_ref.dtype), w3_ref[...],
                     preferred_element_type=jnp.float32)
    logits = jnp.maximum(logits + b3_ref[...], 0.0)

    # Softmax over the feature axis; padded columns -> -inf -> probability 0.
    out_pad = logits.shape[-1]
    if out_size < out_pad:
        col = jax.lax.broadcasted_iota(jnp.int32, logits.shape, 1)
        logits = jnp.where(col < out_size, logits, jnp.float32(-1e30))
    m = jnp.max(logits, axis=-1, keepdims=True)
    e = jnp.exp(logits - m)
    denom = jnp.sum(e, axis=-1, keepdims=True)
    o_ref[...] = (e * pl.reciprocal(denom, approx=approx_recip)).astype(o_ref.dtype)


def prepare_policy_net_params(params, *, use_bf16=True):
    """Zero-pad hidden/output dims to lane-dense multiples of 128 and cast the
    weight matrices for the MXU.  Call this once and cache it (or jit the whole
    forward so XLA constant-folds it): repeating the pad/cast per call re-pays
    the HBM traffic the in-kernel x cast saves."""
    w1, b1, w2, b2, w3, b3 = (params["w1"], params["b1"], params["w2"],
                              params["b2"], params["w3"], params["b3"])
    in_size, hid = w1.shape
    out_size = w3.shape[1]
    hid_pad = _round_up(max(hid, 128), 128)
    out_pad = _round_up(max(out_size, 128), 128)
    if hid_pad != hid:
        w1 = jnp.pad(w1, ((0, 0), (0, hid_pad - hid)))
        b1 = jnp.pad(b1, ((0, 0), (0, hid_pad - hid)))
        w2 = jnp.pad(w2, ((0, hid_pad - hid), (0, hid_pad - hid)))
        b2 = jnp.pad(b2, ((0, 0), (0, hid_pad - hid)))
        w3 = jnp.pad(w3, ((0, hid_pad - hid), (0, 0)))
    if out_pad != out_size:
        w3 = jnp.pad(w3, ((0, 0), (0, out_pad - out_size)))
        b3 = jnp.pad(b3, ((0, 0), (0, out_pad - out_size)))
    mxu_dtype = jnp.bfloat16 if use_bf16 else w1.dtype
    return dict(
        w1=w1.astype(mxu_dtype), b1=b1.astype(jnp.float32),
        w2=w2.astype(mxu_dtype), b2=b2.astype(jnp.float32),
        w3=w3.astype(mxu_dtype), b3=b3.astype(jnp.float32),
        in_size=in_size, hid_pad=hid_pad,
        out_size=out_size, out_pad=out_pad, use_bf16=use_bf16)


def policy_net_forward(x, params=None, *, prepared=None, block_b=1024,
                       use_bf16=True):
    """x: (B, input_size). params: dict w1,b1,w2,b2,w3,b3 with W as (in, out).
    Pass `prepared=prepare_policy_net_params(params, ...)` to reuse the
    padded/cast weights across calls."""
    if prepared is None:
        prepared = prepare_policy_net_params(params, use_bf16=use_bf16)
    p = prepared
    in_size, hid_pad = p["in_size"], p["hid_pad"]
    out_size, out_pad = p["out_size"], p["out_pad"]
    use_bf16 = p["use_bf16"]
    B = x.shape[0]
    assert x.shape[1] == in_size

    # Batch tile: bf16 sublane pack is 16 rows (f32: 8); split the batch into
    # >= 2 tiles so both v7x TensorCores get work and the x/out DMAs pipeline.
    sub = 16 if use_bf16 else 8
    if B <= sub:
        tb = B                              # single full-extent block
    else:
        tb = max(sub, min(block_b, _round_up(pl.cdiv(B, 2), sub)))

    # Generation-aware VMEM budget (v5e/v6e: 128 MiB, v7x: 64 MiB physical).
    try:
        vmem_cap = int(pltpu.get_tpu_info().vmem_capacity_bytes)
    except Exception:
        vmem_cap = 64 << 20                 # conservative (v7x) fallback
    budget = int(0.75 * vmem_cap)

    in_bytes = 2 if use_bf16 else 4
    weight_bytes = in_bytes * (in_size * hid_pad + hid_pad * hid_pad
                               + hid_pad * out_pad)
    bias_bytes = 4 * (2 * hid_pad + out_pad)

    def vmem_need(rows, weight_bufs):
        return (2 * rows * in_size * 4              # double-buffered f32 x tiles
                + 2 * rows * out_pad * 4            # double-buffered f32 out tiles
                + weight_bufs * (weight_bytes + bias_bytes)   # resident weights
                + 4 * rows * (2 * hid_pad + 2 * out_pad))     # live intermediates

    # Shrink the batch tile (never the resident weights) if the conservative
    # (double-buffered-weight) estimate does not fit the budget.
    while tb > sub and vmem_need(tb, 2) > budget:
        tb = max(sub, _round_up(tb // 2, sub))
    # TODO(synk): for hidden sizes whose resident w2 alone exceeds the budget
    # (hid >~ 4K bf16 on v7x's 64 MiB), add a K-tiled grid axis ("arbitrary")
    # with an f32 VMEM accumulator instead of holding whole weights resident.

    vmem_limit = int(min(max(int(1.25 * vmem_need(tb, 2)) + (2 << 20), 8 << 20),
                         budget))

    grid = (pl.cdiv(B, tb),)
    flops = 2 * B * (in_size * hid_pad + hid_pad * hid_pad + hid_pad * out_pad)
    bytes_accessed = (B * in_size * 4 + B * out_pad * 4
                      + weight_bytes + bias_bytes)
    kernel = functools.partial(policy_net_kernel, out_size=out_size,
                               approx_recip=use_bf16)
    args = (x, p["w1"], p["b1"], p["w2"], p["b2"], p["w3"], p["b3"])

    def build(weight_buffers):
        pm = pl.Buffered(weight_buffers) if weight_buffers is not None else None
        const = lambda i: (0, 0)   # weights/biases: same block every step
        wspec = lambda a: pl.BlockSpec(a.shape, const, pipeline_mode=pm)
        in_specs = [pl.BlockSpec((tb, in_size), lambda i: (i, 0)),
                    wspec(p["w1"]), wspec(p["b1"]),
                    wspec(p["w2"]), wspec(p["b2"]),
                    wspec(p["w3"]), wspec(p["b3"])]
        return pl.pallas_call(
            kernel,
            out_shape=jax.ShapeDtypeStruct((B, out_pad), jnp.float32),
            grid=grid,
            in_specs=in_specs,
            out_specs=pl.BlockSpec((tb, out_pad), lambda i: (i, 0)),
            compiler_params=pltpu.CompilerParams(
                dimension_semantics=("parallel",),
                vmem_limit_bytes=vmem_limit),
            cost_estimate=pl.CostEstimate(
                flops=flops,
                transcendentals=B * out_pad,
                bytes_accessed=bytes_accessed))

    try:
        # Resident (constant-index) weights: single buffer halves their VMEM.
        out = build(1)(*args)
    except Exception:
        # Fallback: default double-buffering if pl.Buffered(1) is rejected.
        out = build(None)(*args)

    return out[:, :out_size]


def init_policy_net_params(key, input_size, hidden_size, output_size):
    """Deterministic init mimicking PyTorch's U(-1/sqrt(fan_in), +1/sqrt(fan_in))."""
    ks = jax.random.split(key, 6)

    def linear(kw, kb, fan_in, fan_out):
        bound = 1.0 / jnp.sqrt(jnp.float32(fan_in))
        w = jax.random.uniform(kw, (fan_in, fan_out), jnp.float32, -bound, bound)
        b = jax.random.uniform(kb, (1, fan_out), jnp.float32, -bound, bound)
        return w, b

    w1, b1 = linear(ks[0], ks[1], input_size, hidden_size)
    w2, b2 = linear(ks[2], ks[3], hidden_size, hidden_size)
    w3, b3 = linear(ks[4], ks[5], hidden_size, output_size)
    return {"w1": w1, "b1": b1, "w2": w2, "b2": b2, "w3": w3, "b3": b3}


def policy_net_ref(x, p):
    """Pure-JAX reference matching the PyTorch forward."""
    h1 = jnp.maximum(x @ p["w1"] + p["b1"], 0.0)
    h2 = jnp.maximum(h1 @ p["w2"] + p["b2"], 0.0)
    logits = jnp.maximum(h2 @ p["w3"] + p["b3"], 0.0)
    return jax.nn.softmax(logits, axis=-1)


if __name__ == "__main__":
    key = jax.random.PRNGKey(0)
    k_x, k_p = jax.random.split(key)

    batch, input_size, hidden_size, output_size = 4, 8, 32, 4
    x = jax.random.normal(k_x, (batch, input_size), jnp.float32)
    params = init_policy_net_params(k_p, input_size, hidden_size, output_size)

    ref = policy_net_ref(x, params)

    # Full-precision path (exact reciprocal): tight check against the reference.
    out_f32 = jax.block_until_ready(policy_net_forward(x, params, use_bf16=False))
    assert out_f32.shape == (batch, output_size)
    assert jnp.allclose(out_f32, ref, atol=1e-4, rtol=1e-4)
    assert jnp.allclose(out_f32.sum(axis=-1), 1.0, atol=1e-5)

    # Default fast path (bf16 MXU, f32 accumulate, EUP approx reciprocal) with
    # the padded/cast weights prepared once and reused (hoisted out of the loop).
    prepared = prepare_policy_net_params(params, use_bf16=True)
    out = jax.block_until_ready(policy_net_forward(x, prepared=prepared))
    assert out.shape == (batch, output_size)
    assert jnp.allclose(out, ref, atol=2e-2, rtol=2e-2)
    # approx reciprocal -> rows sum to 1 within ~1e-3 relative.
    assert jnp.allclose(out.sum(axis=-1), 1.0, atol=5e-3)

    print("KERNEL_OK")
</pallas_src>

<mosaic_0001>
module attributes {stable_mosaic.version = 11 : i64} {
  func.func @policy_net_kernel(%arg0: i32, %arg1: memref<4x8xf32, #tpu.memory_space<vmem>>, %arg2: memref<8x128xf32, #tpu.memory_space<vmem>>, %arg3: memref<1x128xf32, #tpu.memory_space<vmem>>, %arg4: memref<128x128xf32, #tpu.memory_space<vmem>>, %arg5: memref<1x128xf32, #tpu.memory_space<vmem>>, %arg6: memref<128x128xf32, #tpu.memory_space<vmem>>, %arg7: memref<1x128xf32, #tpu.memory_space<vmem>>, %arg8: memref<4x128xf32, #tpu.memory_space<vmem>>) attributes {dimension_semantics = [#tpu.dimension_semantics<parallel>], iteration_bounds = array<i64: 1>, scalar_prefetch = 0 : i64, scratch_operands = 0 : i64, tpu.core_type = #tpu.core_type<tc>, window_params = [{transform_indices = @transform_0, window_bounds = array<i64: 4, 8>}, {pipeline_mode = #tpu.pipeline_mode<synchronous>, transform_indices = @transform_1, window_bounds = array<i64: 8, 128>}, {pipeline_mode = #tpu.pipeline_mode<synchronous>, transform_indices = @transform_2, window_bounds = array<i64: 1, 128>}, {pipeline_mode = #tpu.pipeline_mode<synchronous>, transform_indices = @transform_3, window_bounds = array<i64: 128, 128>}, {pipeline_mode = #tpu.pipeline_mode<synchronous>, transform_indices = @transform_4, window_bounds = array<i64: 1, 128>}, {pipeline_mode = #tpu.pipeline_mode<synchronous>, transform_indices = @transform_5, window_bounds = array<i64: 128, 128>}, {pipeline_mode = #tpu.pipeline_mode<synchronous>, transform_indices = @transform_6, window_bounds = array<i64: 1, 128>}, {transform_indices = @transform_7, window_bounds = array<i64: 4, 128>}]} {
    %c0 = arith.constant 0 : index
    %c0_0 = arith.constant 0 : index
    %0 = vector.load %arg1[%c0, %c0_0] : memref<4x8xf32, #tpu.memory_space<vmem>>, vector<4x8xf32>
    %c0_1 = arith.constant 0 : index
    %c0_2 = arith.constant 0 : index
    %1 = vector.load %arg2[%c0_1, %c0_2] : memref<8x128xf32, #tpu.memory_space<vmem>>, vector<8x128xf32>
    %cst = arith.constant dense<0.000000e+00> : vector<4x128xf32>
    %2 = tpu.matmul %0, %1, %cst {dimension_numbers = #tpu.dot_dimension_numbers<[1], [0], [0], [1], [0, 0, 1, 1], [], []>} : vector<4x8xf32>, vector<8x128xf32>, vector<4x128xf32> -> vector<4x128xf32>
    %c0_3 = arith.constant 0 : index
    %c0_4 = arith.constant 0 : index
    %3 = vector.load %arg3[%c0_3, %c0_4] : memref<1x128xf32, #tpu.memory_space<vmem>>, vector<1x128xf32>
    %4 = vector.broadcast %3 : vector<1x128xf32> to vector<4x128xf32>
    %5 = arith.addf %2, %4 : vector<4x128xf32>
    %cst_5 = arith.constant 0.000000e+00 : f32
    %6 = vector.broadcast %cst_5 : f32 to vector<4x128xf32>
    %7 = arith.maximumf %5, %6 : vector<4x128xf32>
    %c0_6 = arith.constant 0 : index
    %c0_7 = arith.constant 0 : index
    %8 = vector.load %arg4[%c0_6, %c0_7] : memref<128x128xf32, #tpu.memory_space<vmem>>, vector<128x128xf32>
    %cst_8 = arith.constant dense<0.000000e+00> : vector<4x128xf32>
    %9 = tpu.matmul %7, %8, %cst_8 {dimension_numbers = #tpu.dot_dimension_numbers<[1], [0], [0], [1], [0, 0, 1, 1], [], []>} : vector<4x128xf32>, vector<128x128xf32>, vector<4x128xf32> -> vector<4x128xf32>
    %c0_9 = arith.constant 0 : index
    %c0_10 = arith.constant 0 : index
    %10 = vector.load %arg5[%c0_9, %c0_10] : memref<1x128xf32, #tpu.memory_space<vmem>>, vector<1x128xf32>
    %11 = vector.broadcast %10 : vector<1x128xf32> to vector<4x128xf32>
    %12 = arith.addf %9, %11 : vector<4x128xf32>
    %cst_11 = arith.constant 0.000000e+00 : f32
    %13 = vector.broadcast %cst_11 : f32 to vector<4x128xf32>
    %14 = arith.maximumf %12, %13 : vector<4x128xf32>
    %c0_12 = arith.constant 0 : index
    %c0_13 = arith.constant 0 : index
    %15 = vector.load %arg6[%c0_12, %c0_13] : memref<128x128xf32, #tpu.memory_space<vmem>>, vector<128x128xf32>
    %cst_14 = arith.constant dense<0.000000e+00> : vector<4x128xf32>
    %16 = tpu.matmul %14, %15, %cst_14 {dimension_numbers = #tpu.dot_dimension_numbers<[1], [0], [0], [1], [0, 0, 1, 1], [], []>} : vector<4x128xf32>, vector<128x128xf32>, vector<4x128xf32> -> vector<4x128xf32>
    %c0_15 = arith.constant 0 : index
    %c0_16 = arith.constant 0 : index
    %17 = vector.load %arg7[%c0_15, %c0_16] : memref<1x128xf32, #tpu.memory_space<vmem>>, vector<1x128xf32>
    %18 = vector.broadcast %17 : vector<1x128xf32> to vector<4x128xf32>
    %19 = arith.addf %16, %18 : vector<4x128xf32>
    %cst_17 = arith.constant 0.000000e+00 : f32
    %20 = vector.broadcast %cst_17 : f32 to vector<4x128xf32>
    %21 = arith.maximumf %19, %20 : vector<4x128xf32>
    %22 = tpu.iota {dimensions = array<i32: 1>} : vector<4x128xi32>
    %c4_i32 = arith.constant 4 : i32
    %23 = vector.broadcast %c4_i32 : i32 to vector<4x128xi32>
    %24 = arith.cmpi slt, %22, %23 : vector<4x128xi32>
    %cst_18 = arith.constant -1.000000e+30 : f32
    %25 = vector.broadcast %cst_18 : f32 to vector<4x128xf32>
    %26 = arith.select %24, %21, %25 : vector<4x128xi1>, vector<4x128xf32>
    %cst_19 = arith.constant dense<0xFF800000> : vector<4xf32>
    %27 = vector.multi_reduction <maximumf>, %26, %cst_19 [1] : vector<4x128xf32> to vector<4xf32>
    %28 = vector.shape_cast %27 : vector<4xf32> to vector<4x1xf32>
    %29 = vector.broadcast %28 : vector<4x1xf32> to vector<4x128xf32>
    %30 = arith.subf %26, %29 : vector<4x128xf32>
    %31 = math.exp %30 : vector<4x128xf32>
    %cst_20 = arith.constant dense<0.000000e+00> : vector<4xf32>
    %32 = vector.multi_reduction <add>, %31, %cst_20 [1] : vector<4x128xf32> to vector<4xf32>
    %33 = vector.shape_cast %32 : vector<4xf32> to vector<4x1xf32>
    %34 = tpu.reciprocal %33 : vector<4x1xf32> -> vector<4x1xf32>
    %35 = vector.broadcast %34 : vector<4x1xf32> to vector<4x128xf32>
    %36 = arith.mulf %31, %35 : vector<4x128xf32>
    %c0_21 = arith.constant 0 : index
    %c0_22 = arith.constant 0 : index
    %37 = vector.load %arg8[%c0_21, %c0_22] : memref<4x128xf32, #tpu.memory_space<vmem>>, vector<4x128xf32>
    tpu.vector_store %arg8[%c0_21, %c0_22], %36 {strides = array<i32>} : memref<4x128xf32, #tpu.memory_space<vmem>>, vector<4x128xf32>,
    return
  }
  func.func @transform_0(%arg0: i32) -> (i32, i32) {
    %c0_i32 = arith.constant 0 : i32
    %c0_i32_0 = arith.constant 0 : i32
    return %arg0, %c0_i32 : i32, i32
  }
  func.func @transform_1(%arg0: i32) -> (i32, i32) {
    %c0_i32 = arith.constant 0 : i32
    %c0_i32_0 = arith.constant 0 : i32
    %c0_i32_1 = arith.constant 0 : i32
    return %c0_i32, %c0_i32_0 : i32, i32
  }
  func.func @transform_2(%arg0: i32) -> (i32, i32) {
    %c0_i32 = arith.constant 0 : i32
    %c0_i32_0 = arith.constant 0 : i32
    %c0_i32_1 = arith.constant 0 : i32
    return %c0_i32, %c0_i32_0 : i32, i32
  }
  func.func @transform_3(%arg0: i32) -> (i32, i32) {
    %c0_i32 = arith.constant 0 : i32
    %c0_i32_0 = arith.constant 0 : i32
    %c0_i32_1 = arith.constant 0 : i32
    return %c0_i32, %c0_i32_0 : i32, i32
  }
  func.func @transform_4(%arg0: i32) -> (i32, i32) {
    %c0_i32 = arith.constant 0 : i32
    %c0_i32_0 = arith.constant 0 : i32
    %c0_i32_1 = arith.constant 0 : i32
    return %c0_i32, %c0_i32_0 : i32, i32
  }
  func.func @transform_5(%arg0: i32) -> (i32, i32) {
    %c0_i32 = arith.constant 0 : i32
    %c0_i32_0 = arith.constant 0 : i32
    %c0_i32_1 = arith.constant 0 : i32
    return %c0_i32, %c0_i32_0 : i32, i32
  }
  func.func @transform_6(%arg0: i32) -> (i32, i32) {
    %c0_i32 = arith.constant 0 : i32
    %c0_i32_0 = arith.constant 0 : i32
    %c0_i32_1 = arith.constant 0 : i32
    return %c0_i32, %c0_i32_0 : i32, i32
  }
  func.func @transform_7(%arg0: i32) -> (i32, i32) {
    %c0_i32 = arith.constant 0 : i32
    %c0_i32_0 = arith.constant 0 : i32
    return %arg0, %c0_i32 : i32, i32
  }
}

module attributes {stable_mosaic.version = 11 : i64} {
  func.func @policy_net_kernel(%arg0: i32, %arg1: memref<4x8xf32, #tpu.memory_space<vmem>>, %arg2: memref<8x128xf32, #tpu.memory_space<vmem>>, %arg3: memref<1x128xf32, #tpu.memory_space<vmem>>, %arg4: memref<128x128xf32, #tpu.memory_space<vmem>>, %arg5: memref<1x128xf32, #tpu.memory_space<vmem>>, %arg6: memref<128x128xf32, #tpu.memory_space<vmem>>, %arg7: memref<1x128xf32, #tpu.memory_space<vmem>>, %arg8: memref<4x128xf32, #tpu.memory_space<vmem>>) attributes {dimension_semantics = [#tpu.dimension_semantics<parallel>], iteration_bounds = array<i64: 1>, scalar_prefetch = 0 : i64, scratch_operands = 0 : i64, tpu.core_type = #tpu.core_type<tc>, window_params = [{transform_indices = @transform_0, window_bounds = array<i64: 4, 8>}, {pipeline_mode = #tpu.pipeline_mode<synchronous>, transform_indices = @transform_1, window_bounds = array<i64: 8, 128>}, {pipeline_mode = #tpu.pipeline_mode<synchronous>, transform_indices = @transform_2, window_bounds = array<i64: 1, 128>}, {pipeline_mode = #tpu.pipeline_mode<synchronous>, transform_indices = @transform_3, window_bounds = array<i64: 128, 128>}, {pipeline_mode = #tpu.pipeline_mode<synchronous>, transform_indices = @transform_4, window_bounds = array<i64: 1, 128>}, {pipeline_mode = #tpu.pipeline_mode<synchronous>, transform_indices = @transform_5, window_bounds = array<i64: 128, 128>}, {pipeline_mode = #tpu.pipeline_mode<synchronous>, transform_indices = @transform_6, window_bounds = array<i64: 1, 128>}, {transform_indices = @transform_7, window_bounds = array<i64: 4, 128>}]} {
    %c0 = arith.constant 0 : index
    %c0_0 = arith.constant 0 : index
    %0 = vector.load %arg1[%c0, %c0_0] : memref<4x8xf32, #tpu.memory_space<vmem>>, vector<4x8xf32>
    %c0_1 = arith.constant 0 : index
    %c0_2 = arith.constant 0 : index
    %1 = vector.load %arg2[%c0_1, %c0_2] : memref<8x128xf32, #tpu.memory_space<vmem>>, vector<8x128xf32>
    %cst = arith.constant dense<0.000000e+00> : vector<4x128xf32>
    %2 = tpu.matmul %0, %1, %cst {dimension_numbers = #tpu.dot_dimension_numbers<[1], [0], [0], [1], [0, 0, 1, 1], [], []>} : vector<4x8xf32>, vector<8x128xf32>, vector<4x128xf32> -> vector<4x128xf32>
    %c0_3 = arith.constant 0 : index
    %c0_4 = arith.constant 0 : index
    %3 = vector.load %arg3[%c0_3, %c0_4] : memref<1x128xf32, #tpu.memory_space<vmem>>, vector<1x128xf32>
    %4 = vector.broadcast %3 : vector<1x128xf32> to vector<4x128xf32>
    %5 = arith.addf %2, %4 : vector<4x128xf32>
    %cst_5 = arith.constant 0.000000e+00 : f32
    %6 = vector.broadcast %cst_5 : f32 to vector<4x128xf32>
    %7 = arith.maximumf %5, %6 : vector<4x128xf32>
    %c0_6 = arith.constant 0 : index
    %c0_7 = arith.constant 0 : index
    %8 = vector.load %arg4[%c0_6, %c0_7] : memref<128x128xf32, #tpu.memory_space<vmem>>, vector<128x128xf32>
    %cst_8 = arith.constant dense<0.000000e+00> : vector<4x128xf32>
    %9 = tpu.matmul %7, %8, %cst_8 {dimension_numbers = #tpu.dot_dimension_numbers<[1], [0], [0], [1], [0, 0, 1, 1], [], []>} : vector<4x128xf32>, vector<128x128xf32>, vector<4x128xf32> -> vector<4x128xf32>
    %c0_9 = arith.constant 0 : index
    %c0_10 = arith.constant 0 : index
    %10 = vector.load %arg5[%c0_9, %c0_10] : memref<1x128xf32, #tpu.memory_space<vmem>>, vector<1x128xf32>
    %11 = vector.broadcast %10 : vector<1x128xf32> to vector<4x128xf32>
    %12 = arith.addf %9, %11 : vector<4x128xf32>
    %cst_11 = arith.constant 0.000000e+00 : f32
    %13 = vector.broadcast %cst_11 : f32 to vector<4x128xf32>
    %14 = arith.maximumf %12, %13 : vector<4x128xf32>
    %c0_12 = arith.constant 0 : index
    %c0_13 = arith.constant 0 : index
    %15 = vector.load %arg6[%c0_12, %c0_13] : memref<128x128xf32, #tpu.memory_space<vmem>>, vector<128x128xf32>
    %cst_14 = arith.constant dense<0.000000e+00> : vector<4x128xf32>
    %16 = tpu.matmul %14, %15, %cst_14 {dimension_numbers = #tpu.dot_dimension_numbers<[1], [0], [0], [1], [0, 0, 1, 1], [], []>} : vector<4x128xf32>, vector<128x128xf32>, vector<4x128xf32> -> vector<4x128xf32>
    %c0_15 = arith.constant 0 : index
    %c0_16 = arith.constant 0 : index
    %17 = vector.load %arg7[%c0_15, %c0_16] : memref<1x128xf32, #tpu.memory_space<vmem>>, vector<1x128xf32>
    %18 = vector.broadcast %17 : vector<1x128xf32> to vector<4x128xf32>
    %19 = arith.addf %16, %18 : vector<4x128xf32>
    %cst_17 = arith.constant 0.000000e+00 : f32
    %20 = vector.broadcast %cst_17 : f32 to vector<4x128xf32>
    %21 = arith.maximumf %19, %20 : vector<4x128xf32>
    %22 = tpu.iota {dimensions = array<i32: 1>} : vector<4x128xi32>
    %c4_i32 = arith.constant 4 : i32
    %23 = vector.broadcast %c4_i32 : i32 to vector<4x128xi32>
    %24 = arith.cmpi slt, %22, %23 : vector<4x128xi32>
    %cst_18 = arith.constant -1.000000e+30 : f32
    %25 = vector.broadcast %cst_18 : f32 to vector<4x128xf32>
    %26 = arith.select %24, %21, %25 : vector<4x128xi1>, vector<4x128xf32>
    %cst_19 = arith.constant dense<0xFF800000> : vector<4xf32>
    %27 = vector.multi_reduction <maximumf>, %26, %cst_19 [1] : vector<4x128xf32> to vector<4xf32>
    %28 = vector.shape_cast %27 : vector<4xf32> to vector<4x1xf32>
    %29 = vector.broadcast %28 : vector<4x1xf32> to vector<4x128xf32>
    %30 = arith.subf %26, %29 : vector<4x128xf32>
    %31 = math.exp %30 : vector<4x128xf32>
    %cst_20 = arith.constant dense<0.000000e+00> : vector<4xf32>
    %32 = vector.multi_reduction <add>, %31, %cst_20 [1] : vector<4x128xf32> to vector<4xf32>
    %33 = vector.shape_cast %32 : vector<4xf32> to vector<4x1xf32>
    %34 = tpu.reciprocal %33 : vector<4x1xf32> -> vector<4x1xf32>
    %35 = vector.broadcast %34 : vector<4x1xf32> to vector<4x128xf32>
    %36 = arith.mulf %31, %35 : vector<4x128xf32>
    %c0_21 = arith.constant 0 : index
    %c0_22 = arith.constant 0 : index
    %37 = vector.load %arg8[%c0_21, %c0_22] : memref<4x128xf32, #tpu.memory_space<vmem>>, vector<4x128xf32>
    tpu.vector_store %arg8[%c0_21, %c0_22], %36 {strides = array<i32>} : memref<4x128xf32, #tpu.memory_space<vmem>>, vector<4x128xf32>,
    return
  }
  func.func @transform_0(%arg0: i32) -> (i32, i32) {
    %c0_i32 = arith.constant 0 : i32
    %c0_i32_0 = arith.constant 0 : i32
    return %arg0, %c0_i32 : i32, i32
  }
  func.func @transform_1(%arg0: i32) -> (i32, i32) {
    %c0_i32 = arith.constant 0 : i32
    %c0_i32_0 = arith.constant 0 : i32
    %c0_i32_1 = arith.constant 0 : i32
    return %c0_i32, %c0_i32_0 : i32, i32
  }
  func.func @transform_2(%arg0: i32) -> (i32, i32) {
    %c0_i32 = arith.constant 0 : i32
    %c0_i32_0 = arith.constant 0 : i32
    %c0_i32_1 = arith.constant 0 : i32
    return %c0_i32, %c0_i32_0 : i32, i32
  }
  func.func @transform_3(%arg0: i32) -> (i32, i32) {
    %c0_i32 = arith.constant 0 : i32
    %c0_i32_0 = arith.constant 0 : i32
    %c0_i32_1 = arith.constant 0 : i32
    return %c0_i32, %c0_i32_0 : i32, i32
  }
  func.func @transform_4(%arg0: i32) -> (i32, i32) {
    %c0_i32 = arith.constant 0 : i32
    %c0_i32_0 = arith.constant 0 : i32
    %c0_i32_1 = arith.constant 0 : i32
    return %c0_i32, %c0_i32_0 : i32, i32
  }
  func.func @transform_5(%arg0: i32) -> (i32, i32) {
    %c0_i32 = arith.constant 0 : i32
    %c0_i32_0 = arith.constant 0 : i32
    %c0_i32_1 = arith.constant 0 : i32
    return %c0_i32, %c0_i32_0 : i32, i32
  }
  func.func @transform_6(%arg0: i32) -> (i32, i32) {
    %c0_i32 = arith.constant 0 : i32
    %c0_i32_0 = arith.constant 0 : i32
    %c0_i32_1 = arith.constant 0 : i32
    return %c0_i32, %c0_i32_0 : i32, i32
  }
  func.func @transform_7(%arg0: i32) -> (i32, i32) {
    %c0_i32 = arith.constant 0 : i32
    %c0_i32_0 = arith.constant 0 : i32
    return %arg0, %c0_i32 : i32, i32
  }
}

</mosaic_0001>

<bundles_post_ra>
// kernel: tpu_custom_call.1
= control target key start
LH: loop header
LB: loop body
LE: loop exit
PB: predicated region body
PF: predicated region fallthrough
CT: control target
= control target key end

     0   :  { %12 = vsyncpa [#allocation3], 0  ;;  %s817_s0 = inlined_call_operand.hbm [shape: f32[4,8], index: 0, kind: input, shape index: {}]   ;;  %s818_s1 = inlined_call_operand.hbm [shape: f32[8,128], index: 1, kind: input, shape index: {}]   ;;  %s819_s2 = inlined_call_operand.vmem [shape: f32[1,128], index: 2, kind: input, shape index: {}]   ;;  %s820_s3 = inlined_call_operand.hbm [shape: f32[128,128], index: 3, kind: input, shape index: {}]   ;;  %s821_s4 = inlined_call_operand.vmem [shape: f32[1,128], index: 4, kind: input, shape index: {}]   ;;  %s822_s5 = inlined_call_operand.hbm [shape: f32[128,128], index: 5, kind: input, shape index: {}]   ;;  %s823_s6 = inlined_call_operand.vmem [shape: f32[1,128], index: 6, kind: input, shape index: {}]   ;;  %s824_s7 = inlined_call_operand.hbm [shape: f32[4,128], index: 7, kind: output, shape index: {}]  }
   0x1   :  { %13 = vsyncpa [#allocation6], 0 }
   0x2   :  { %14 = vsyncpa [#allocation9], 0 }
   0x3   :  { %15 = vsyncpa [#allocation4], 0  ;;  %s679_s24 = smov [#allocation5]   ;;  %s680_s26 = smov [#allocation2]  }
   0x4   :  { %s32_s25 = sshll.u32 %s679_s24, 4  ;;  %s22_s27 = sshll.u32 %s680_s26, 4  ;;  %s33_s25 = int_to_ptr.vmem [resolvable:$true] %s32_s25  ;;  %s23_s27 = int_to_ptr.vmem [resolvable:$true] %s22_s27 }
   0x5   :  { %s561_s30 = scalar_lea.hbm %s818_s1, 128 }
   0x6   :  { %p562_p0 = scmp.ne.s32.totalorder %s818_s1, %s561_s30  ;;  %p565_p1 = scmp.lt.u32.totalorder %s561_s30, %s818_s1 }
   0x8   :  { %p567_p2 = pnand %p565_p1, %p562_p0 }
   0xa   :  { %570 = shalt.err (!%p567_p2)
}
   0xb   :  { %s571_s12 = scalar_lea.vmem %s33_s25, 128  ;;  %p576_p4 = scmp.lt.s32.totalorder %s33_s25, %s33_s25 }
   0xc   :  { %p572_p3 = scmp.ne.s32.totalorder %s33_s25, %s571_s12  ;;  %p577_p5 = scmp.lt.s32.totalorder %s571_s12, %s571_s12 }
   0xe   :  { %p578_p6 = por %p577_p5, %p576_p4 }
  0x10   :  { %p579_p7 = pnand %p578_p6, %p572_p3 }
  0x12   :  { %582 = shalt.err (!%p579_p7)
}
  0x13   :  { %35 = dma.hbm_to_vmem [thread:$0]  %s818_s1, 128, %s33_s25, [#allocation6]  }
  0x14   :  { %s583_s17 = scalar_lea.hbm %s817_s0, 64 }
  0x15   :  { %p584_p8 = scmp.ne.s32.totalorder %s817_s0, %s583_s17  ;;  %p587_p9 = scmp.lt.u32.totalorder %s583_s17, %s817_s0 }
  0x17   :  { %p589_p10 = pnand %p587_p9, %p584_p8 }
  0x19   :  { %592 = shalt.err (!%p589_p10)
}
  0x1a   :  { %s593_s22 = scalar_lea.vmem %s23_s27, 64  ;;  %p598_p12 = scmp.lt.s32.totalorder %s23_s27, %s23_s27 }
  0x1b   :  { %p594_p11 = scmp.ne.s32.totalorder %s23_s27, %s593_s22  ;;  %p599_p13 = scmp.lt.s32.totalorder %s593_s22, %s593_s22 }
  0x1d   :  { %p600_p0 = por %p599_p13, %p598_p12 }
  0x1f   :  { %p601_p1 = pnand %p600_p0, %p594_p11 }
  0x21   :  { %604 = shalt.err (!%p601_p1)
}
  0x22   :  { %25 = dma.hbm_to_vmem [thread:$0]  %s817_s0, 64, %s23_s27, [#allocation3]  }
  0x23   :  { %s681_s24 = smov [#allocation7]   ;;  %s605_s29 = scalar_lea.hbm %s820_s3, 2048 }
  0x24   :  { %s43_s25 = sshll.u32 %s681_s24, 4  ;;  %p606_p2 = scmp.ne.s32.totalorder %s820_s3, %s605_s29  ;;  %s44_s25 = int_to_ptr.vmem [resolvable:$true] %s43_s25 }
  0x25   :  { %p609_p3 = scmp.lt.u32.totalorder %s605_s29, %s820_s3 }
  0x27   :  { %p611_p4 = pnand %p609_p3, %p606_p2 }
  0x29   :  { %614 = shalt.err (!%p611_p4)
}
  0x2a   :  { %s615_s11 = scalar_lea.vmem %s44_s25, 2048  ;;  %p620_p6 = scmp.lt.s32.totalorder %s44_s25, %s44_s25 }
  0x2b   :  { %p616_p5 = scmp.ne.s32.totalorder %s44_s25, %s615_s11  ;;  %p621_p7 = scmp.lt.s32.totalorder %s615_s11, %s615_s11 }
  0x2d   :  { %p622_p8 = por %p621_p7, %p620_p6 }
  0x2f   :  { %p623_p9 = pnand %p622_p8, %p616_p5 }
  0x31   :  { %626 = shalt.err (!%p623_p9)
}
  0x32   :  { %s682_s0 = smov 128   ;;  %s683_s27 = smov 8  }
  0x33   :  { %49 = dma.hbm_to_vmem [thread:$0]  %s820_s3, 2048, %s44_s25, [#allocation6], %s682_s0, %s682_s0, %s683_s27  }
  0x34   :  { %s684_s14 = smov [#allocation8]   ;;  %s627_s18 = scalar_lea.hbm %s822_s5, 2048 }
  0x35   :  { %s57_s15 = sshll.u32 %s684_s14, 4  ;;  %p628_p10 = scmp.ne.s32.totalorder %s822_s5, %s627_s18  ;;  %s58_s15 = int_to_ptr.vmem [resolvable:$true] %s57_s15 }
  0x36   :  { %p631_p11 = scmp.lt.u32.totalorder %s627_s18, %s822_s5 }
  0x38   :  { %p633_p12 = pnand %p631_p11, %p628_p10 }
  0x3a   :  { %636 = shalt.err (!%p633_p12)
}
  0x3b   :  { %s637_s1 = scalar_lea.vmem %s58_s15, 2048  ;;  %p642_p0 = scmp.lt.s32.totalorder %s58_s15, %s58_s15 }
  0x3c   :  { %p638_p13 = scmp.ne.s32.totalorder %s58_s15, %s637_s1  ;;  %p643_p1 = scmp.lt.s32.totalorder %s637_s1, %s637_s1 }
  0x3e   :  { %p644_p2 = por %p643_p1, %p642_p0 }
  0x40   :  { %p645_p3 = pnand %p644_p2, %p638_p13 }
  0x42   :  { %648 = shalt.err (!%p645_p3)
}
  0x43   :  { %63 = dma.hbm_to_vmem [thread:$0]  %s822_s5, 2048, %s58_s15, [#allocation9], %s682_s0, %s682_s0, %s683_s27  }
  0x44   :  { %671 = dma.done.wait [#allocation3], 64  }
  0x45   :  { %672 = vsyncadd [#allocation3], 4294967232 }
  0x46   :  { %673 = dma.done.wait [#allocation6], 2176  }
  0x47   :  { %674 = vsyncadd [#allocation6], 4294965120 }
  0x48   :  { %675 = dma.done.wait [#allocation9], 2048  }
  0x49   :  { %676 = vsyncadd [#allocation9], 4294965248  ;;  %v685_v0 = vmov 0.0   ;;  %vm686_vm0 = vmmov 0   ;;  %v687_v1 = vmov 0.0|0.0   ;;  %vm87_vm1 = vcmask 64512  }
  0x4a   :  { %424 = vmatprep.subr.mxu0 %v685_v0  ;;  %426 = vmatprep.mubr.msk.f32.mxu0 %vm686_vm0, %v685_v0  ;;  %v79_v2 = vld [vmem:[#allocation5] sm:$0xff]  ;;  %v78_v3 = vld [vmem:[#allocation2] sm:$0xf]  ;;  %v162_v4 = vld [vmem:[#allocation7] sm:$0xff]  ;;  %v350_v62 = vlaneseq  ;;  %vm354_vm3 = vcmask 1043456  }
  0x4b   :  { %499 = vmatprep.subr.bf16.mxu1 %v687_v1  ;;  %461 = vmatprep.mubr.msk.f32.mxu1 %vm686_vm0, %v685_v0  ;;  %v163_v5 = vld [vmem:[#allocation7 + $0x8] sm:$0xff]  ;;  %v164_v6 = vld [vmem:[#allocation7 + $0x10] sm:$0xff]  ;;  %v165_v7 = vld [vmem:[#allocation7 + $0x18] sm:$0xff] }
  0x4c   :  { %425 = vmatpush3.msra.mxu0 %v79_v2  ;;  %v500_v8 = vpack.c.bf16 %v163_v5, %v162_v4  ;;  %v503_v9 = vpack.c.bf16 %v165_v7, %v164_v6  ;;  %v166_v10 = vld [vmem:[#allocation7 + $0x20] sm:$0xff]  ;;  %v167_v11 = vld [vmem:[#allocation7 + $0x28] sm:$0xff]  ;;  %v168_v13 = vld [vmem:[#allocation7 + $0x30] sm:$0xff] }
  0x4d   :  { %427 = vmatmul.mubr.msk.f32.vlgmr.msra.gmra.mrb[0].mxu0 %vm87_vm1, %v78_v3  ;;  %523 = vmatprep.subr.bf16.mxu0 %v687_v1  ;;  %v506_v12 = vpack.c.bf16 %v167_v11, %v166_v10  ;;  %v169_v14 = vld [vmem:[#allocation7 + $0x38] sm:$0xff]  ;;  %v170_v16 = vld [vmem:[#allocation7 + $0x40] sm:$0xff]  ;;  %v171_v17 = vld [vmem:[#allocation7 + $0x48] sm:$0xff] }
  0x4e   :  { %496 = vmatprep.mubr.msk.f32.mxu0 %vm686_vm0, %v685_v0  ;;  %501 = vmatpush3.bf16.msra.mxu1 %v500_v8  ;;  %v509_v15 = vpack.c.bf16 %v169_v14, %v168_v13  ;;  %v512_v18 = vpack.c.bf16 %v171_v17, %v170_v16  ;;  %v172_v19 = vld [vmem:[#allocation7 + $0x50] sm:$0xff]  ;;  %v173_v20 = vld [vmem:[#allocation7 + $0x58] sm:$0xff]  ;;  %v174_v22 = vld [vmem:[#allocation7 + $0x60] sm:$0xff]  ;;  %v351_v0 = vand.u32 127, %v350_v62 }
  0x4f   :  { %502 = vmatprep.subr.bf16.mxu1 %v687_v1  ;;  %v515_v21 = vpack.c.bf16 %v173_v20, %v172_v19  ;;  %v175_v23 = vld [vmem:[#allocation7 + $0x68] sm:$0xff]  ;;  %v176_v25 = vld [vmem:[#allocation7 + $0x70] sm:$0xff]  ;;  %v177_v26 = vld [vmem:[#allocation7 + $0x78] sm:$0xff] }
  0x50   :  { %v518_v24 = vpack.c.bf16 %v175_v23, %v174_v22  ;;  %v521_v27 = vpack.c.bf16 %v177_v26, %v176_v25  ;;  %v256_v28 = vld [vmem:[#allocation8] sm:$0xff]  ;;  %v257_v29 = vld [vmem:[#allocation8 + $0x8] sm:$0xff]  ;;  %v258_v30 = vld [vmem:[#allocation8 + $0x10] sm:$0xff]  ;;  %vm352_vm2 = vcmp.lt.s32.totalorder %v351_v0, 4 }
  0x51   :  { %v524_v31 = vpack.c.bf16 %v257_v29, %v256_v28  ;;  %v259_v32 = vld [vmem:[#allocation8 + $0x18] sm:$0xff]  ;;  %v260_v34 = vld [vmem:[#allocation8 + $0x20] sm:$0xff]  ;;  %v261_v35 = vld [vmem:[#allocation8 + $0x28] sm:$0xff] }
  0x52   :  { %504 = vmatpush3.bf16.msra.mxu1 %v503_v9  ;;  %v527_v33 = vpack.c.bf16 %v259_v32, %v258_v30  ;;  %v530_v36 = vpack.c.bf16 %v261_v35, %v260_v34  ;;  %v262_v37 = vld [vmem:[#allocation8 + $0x30] sm:$0xff]  ;;  %v263_v38 = vld [vmem:[#allocation8 + $0x38] sm:$0xff]  ;;  %v264_v40 = vld [vmem:[#allocation8 + $0x40] sm:$0xff] }
  0x53   :  { %505 = vmatprep.subr.bf16.mxu1 %v687_v1  ;;  %525 = vmatpush3.bf16.msra.mxu0 %v524_v31  ;;  %v533_v39 = vpack.c.bf16 %v263_v38, %v262_v37  ;;  %v265_v41 = vld [vmem:[#allocation8 + $0x48] sm:$0xff]  ;;  %v266_v43 = vld [vmem:[#allocation8 + $0x50] sm:$0xff]  ;;  %v267_v44 = vld [vmem:[#allocation8 + $0x58] sm:$0xff] }
  0x54   :  { %526 = vmatprep.subr.bf16.mxu0 %v687_v1  ;;  %v536_v42 = vpack.c.bf16 %v265_v41, %v264_v40  ;;  %v539_v45 = vpack.c.bf16 %v267_v44, %v266_v43  ;;  %v268_v46 = vld [vmem:[#allocation8 + $0x60] sm:$0xff]  ;;  %v269_v47 = vld [vmem:[#allocation8 + $0x68] sm:$0xff]  ;;  %v384_v49 = vld [vmem:[%s819_s2] ss:$0 sm:$0xff] }
  0x55   :  { %v542_v48 = vpack.c.bf16 %v269_v47, %v268_v46  ;;  %v270_v54 = vld [vmem:[#allocation8 + $0x70] sm:$0xff]  ;;  %v271_v55 = vld [vmem:[#allocation8 + $0x78] sm:$0xff] }
  0x56   :  { %507 = vmatpush3.bf16.msra.mxu1 %v506_v12  ;;  %v545_v56 = vpack.c.bf16 %v271_v55, %v270_v54  ;;  %v386_v57 = vld [vmem:[%s821_s4] ss:$0 sm:$0xff]  ;;  %s688_s4 = smov [#allocation10]  }
  0x57   :  { %508 = vmatprep.subr.bf16.mxu1 %v687_v1  ;;  %528 = vmatpush3.bf16.msra.mxu0 %v527_v33  ;;  %v387_v63 = vld [vmem:[%s823_s6] ss:$0 sm:$0xff]  ;;  %s373_s6 = sshll.u32 %s688_s4, 4  ;;  %s374_s6 = int_to_ptr.vmem [resolvable:$true] %s373_s6 }
  0x58   :  { %529 = vmatprep.subr.bf16.mxu0 %v687_v1  ;;  %s649_s29 = scalar_lea.vmem %s374_s6, 64  ;;  %p654_p5 = scmp.lt.s32.totalorder %s374_s6, %s374_s6 }
  0x59   :  { %p650_p4 = scmp.ne.s32.totalorder %s374_s6, %s649_s29  ;;  %p655_p6 = scmp.lt.s32.totalorder %s649_s29, %s649_s29 }
  0x5a   :  { %510 = vmatpush3.bf16.msra.mxu1 %v509_v15 }
  0x5b   :  { %511 = vmatprep.subr.bf16.mxu1 %v687_v1  ;;  %531 = vmatpush3.bf16.msra.mxu0 %v530_v36  ;;  %p656_p7 = por %p655_p6, %p654_p5 }
  0x5c   :  { %532 = vmatprep.subr.bf16.mxu0 %v687_v1 }
  0x5d   :  { %p657_p8 = pnand %p656_p7, %p650_p4 }
  0x5e   :  { %513 = vmatpush3.bf16.msra.mxu1 %v512_v18 }
  0x5f   :  { %514 = vmatprep.subr.bf16.mxu1 %v687_v1  ;;  %534 = vmatpush3.bf16.msra.mxu0 %v533_v39 }
  0x60   :  { %535 = vmatprep.subr.bf16.mxu0 %v687_v1 }
  0x62   :  { %516 = vmatpush3.bf16.msra.mxu1 %v515_v21 }
  0x63   :  { %517 = vmatprep.subr.bf16.mxu1 %v687_v1  ;;  %537 = vmatpush3.bf16.msra.mxu0 %v536_v42 }
  0x64   :  { %538 = vmatprep.subr.bf16.mxu0 %v687_v1 }
  0x66   :  { %519 = vmatpush3.bf16.msra.mxu1 %v518_v24 }
  0x67   :  { %520 = vmatprep.subr.bf16.mxu1 %v687_v1  ;;  %540 = vmatpush3.bf16.msra.mxu0 %v539_v45 }
  0x68   :  { %541 = vmatprep.subr.bf16.mxu0 %v687_v1 }
  0x6a   :  { %522 = vmatpush3.bf16.msra.mxu1 %v521_v27 }
  0x6b   :  { %543 = vmatpush3.bf16.msra.mxu0 %v542_v48 }
  0x6c   :  { %544 = vmatprep.subr.bf16.mxu0 %v687_v1 }
  0x6f   :  { %546 = vmatpush3.bf16.msra.mxu0 %v545_v56 }
 0x120   :  { %v157_v50 = vpop.f32.mrb[0].mxu0 }
 0x121   :  { %v158_v51 = vadd.f32 %v384_v49, %v157_v50  ;;  %v428_v52 = vpop.f32.mrb[1].mxu0 }
 0x123   :  { %v161_v53 = vmax.f32 %v158_v51, 0.0 }
 0x125   :  { %462 = vmatmul.mubr.f32.vlgmr.msra.gmra.mrb[0].mxu1 %v161_v53 }
 0x1f8   :  { %v251_v58 = vpop.f32.mrb[0].mxu1 }
 0x1f9   :  { %v252_v59 = vadd.f32 %v386_v57, %v251_v58  ;;  %v463_v60 = vpop.f32.mrb[1].mxu1 }
 0x1fb   :  { %v255_v61 = vmax.f32 %v252_v59, 0.0 }
 0x1fd   :  { %497 = vmatmul.mubr.f32.vlgmr.msra.gmra.mrb[2].mxu0 %v255_v61 }
 0x2d0   :  { %v345_v1 = vpop.f32.mrb[2].mxu0 }
 0x2d1   :  { %v346_v2 = vadd.f32 %v387_v63, %v345_v1  ;;  %v498_v3 = vpop.f32.mrb[3].mxu0 }
 0x2d3   :  { %v349_v4 = vmax.f32 %v346_v2, 0.0 }
 0x2d5   :  { %v353_v5 = vsel %vm352_vm2, %v349_v4, -1e+30 }
 0x2d6   :  { %v355_v6 = vsel %vm354_vm3, %v353_v5, -inf }
 0x2d7   :  { %356 = vmax.xlane.f32.xlu0 %v355_v6 }
 0x364   :  { %v357_v7 = vpop.xlane.xlu0 %356 }
 0x365   :  { %v358_v8 = vsub.f32 %v353_v5, %v357_v7 }
 0x367   :  { %v359_v9 = vmul.f32 1.442695, %v358_v8 }
 0x369   :  { %557 = vpow2.f32 %v359_v9 }
 0x373   :  { %v558_v10 = vpop.eup %557 }
 0x374   :  { %v361_v11 = vsel %vm354_vm3, %v558_v10, 0.0 }
 0x375   :  { %362 = vadd.xlane.f32.xlu0 %v361_v11 }
 0x402   :  { %v363_v12 = vpop.xlane.xlu0 %362 }
 0x403   :  { %559 = vrcp.f32 %v363_v12 }
 0x40d   :  { %v560_v13 = vpop.eup %559 }
 0x40e   :  { %v365_v14 = vmul.f32 %v560_v13, %v558_v10 }
 0x410   :  { %366 = vst [vmem:[#allocation10] sm:$0xf] %v365_v14 }
 0x411   :  { %660 = shalt.err (!%p657_p8)
}
 0x412   :  { %s661_s9 = scalar_lea.hbm %s824_s7, 64 }
 0x413   :  { %p662_p9 = scmp.ne.s32.totalorder %s824_s7, %s661_s9  ;;  %p665_p10 = scmp.lt.u32.totalorder %s661_s9, %s824_s7 }
 0x415   :  { %p667_p11 = pnand %p665_p10, %p662_p9 }
 0x417   :  { %670 = shalt.err (!%p667_p11)
}
 0x418   :  { %376 = dma.vmem_to_hbm [thread:$0]  %s374_s6, 64, %s824_s7, [#allocation4]  }
 0x419   :  { %677 = dma.done.wait [#allocation4], 64  }
 0x41a   :  { %678 = vsyncadd [#allocation4], 4294967232 }
 0x41b   :  { %380 = vsyncpa [#allocation3], 1 }
 0x41c   :  { %381 = vsyncpa [#allocation6], 1 }
 0x41d   :  { %382 = vsyncpa [#allocation9], 1 }
 0x41e   :  { %383 = vsyncpa [#allocation4], 1 }

// kernel: tpu_custom_call.1
= control target key start
LH: loop header
LB: loop body
LE: loop exit
PB: predicated region body
PF: predicated region fallthrough
CT: control target
= control target key end

     0   :  { %12 = vsyncpa [#allocation3], 0  ;;  %s817_s0 = inlined_call_operand.hbm [shape: f32[4,8], index: 0, kind: input, shape index: {}]   ;;  %s818_s1 = inlined_call_operand.hbm [shape: f32[8,128], index: 1, kind: input, shape index: {}]   ;;  %s819_s2 = inlined_call_operand.vmem [shape: f32[1,128], index: 2, kind: input, shape index: {}]   ;;  %s820_s3 = inlined_call_operand.hbm [shape: f32[128,128], index: 3, kind: input, shape index: {}]   ;;  %s821_s4 = inlined_call_operand.vmem [shape: f32[1,128], index: 4, kind: input, shape index: {}]   ;;  %s822_s5 = inlined_call_operand.hbm [shape: f32[128,128], index: 5, kind: input, shape index: {}]   ;;  %s823_s6 = inlined_call_operand.vmem [shape: f32[1,128], index: 6, kind: input, shape index: {}]   ;;  %s824_s7 = inlined_call_operand.hbm [shape: f32[4,128], index: 7, kind: output, shape index: {}]  }
   0x1   :  { %13 = vsyncpa [#allocation6], 0 }
   0x2   :  { %14 = vsyncpa [#allocation9], 0 }
   0x3   :  { %15 = vsyncpa [#allocation4], 0  ;;  %s679_s24 = smov [#allocation5]   ;;  %s680_s26 = smov [#allocation2]  }
   0x4   :  { %s32_s25 = sshll.u32 %s679_s24, 4  ;;  %s22_s27 = sshll.u32 %s680_s26, 4  ;;  %s33_s25 = int_to_ptr.vmem [resolvable:$true] %s32_s25  ;;  %s23_s27 = int_to_ptr.vmem [resolvable:$true] %s22_s27 }
   0x5   :  { %s561_s30 = scalar_lea.hbm %s818_s1, 128 }
   0x6   :  { %p562_p0 = scmp.ne.s32.totalorder %s818_s1, %s561_s30  ;;  %p565_p1 = scmp.lt.u32.totalorder %s561_s30, %s818_s1 }
   0x8   :  { %p567_p2 = pnand %p565_p1, %p562_p0 }
   0xa   :  { %570 = shalt.err (!%p567_p2)
}
   0xb   :  { %s571_s12 = scalar_lea.vmem %s33_s25, 128  ;;  %p576_p4 = scmp.lt.s32.totalorder %s33_s25, %s33_s25 }
   0xc   :  { %p572_p3 = scmp.ne.s32.totalorder %s33_s25, %s571_s12  ;;  %p577_p5 = scmp.lt.s32.totalorder %s571_s12, %s571_s12 }
   0xe   :  { %p578_p6 = por %p577_p5, %p576_p4 }
  0x10   :  { %p579_p7 = pnand %p578_p6, %p572_p3 }
  0x12   :  { %582 = shalt.err (!%p579_p7)
}
  0x13   :  { %35 = dma.hbm_to_vmem [thread:$0]  %s818_s1, 128, %s33_s25, [#allocation6]  }
  0x14   :  { %s583_s17 = scalar_lea.hbm %s817_s0, 64 }
  0x15   :  { %p584_p8 = scmp.ne.s32.totalorder %s817_s0, %s583_s17  ;;  %p587_p9 = scmp.lt.u32.totalorder %s583_s17, %s817_s0 }
  0x17   :  { %p589_p10 = pnand %p587_p9, %p584_p8 }
  0x19   :  { %592 = shalt.err (!%p589_p10)
}
  0x1a   :  { %s593_s22 = scalar_lea.vmem %s23_s27, 64  ;;  %p598_p12 = scmp.lt.s32.totalorder %s23_s27, %s23_s27 }
  0x1b   :  { %p594_p11 = scmp.ne.s32.totalorder %s23_s27, %s593_s22  ;;  %p599_p13 = scmp.lt.s32.totalorder %s593_s22, %s593_s22 }
  0x1d   :  { %p600_p0 = por %p599_p13, %p598_p12 }
  0x1f   :  { %p601_p1 = pnand %p600_p0, %p594_p11 }
  0x21   :  { %604 = shalt.err (!%p601_p1)
}
  0x22   :  { %25 = dma.hbm_to_vmem [thread:$0]  %s817_s0, 64, %s23_s27, [#allocation3]  }
  0x23   :  { %s681_s24 = smov [#allocation7]   ;;  %s605_s29 = scalar_lea.hbm %s820_s3, 2048 }
  0x24   :  { %s43_s25 = sshll.u32 %s681_s24, 4  ;;  %p606_p2 = scmp.ne.s32.totalorder %s820_s3, %s605_s29  ;;  %s44_s25 = int_to_ptr.vmem [resolvable:$true] %s43_s25 }
  0x25   :  { %p609_p3 = scmp.lt.u32.totalorder %s605_s29, %s820_s3 }
  0x27   :  { %p611_p4 = pnand %p609_p3, %p606_p2 }
  0x29   :  { %614 = shalt.err (!%p611_p4)
}
  0x2a   :  { %s615_s11 = scalar_lea.vmem %s44_s25, 2048  ;;  %p620_p6 = scmp.lt.s32.totalorder %s44_s25, %s44_s25 }
  0x2b   :  { %p616_p5 = scmp.ne.s32.totalorder %s44_s25, %s615_s11  ;;  %p621_p7 = scmp.lt.s32.totalorder %s615_s11, %s615_s11 }
  0x2d   :  { %p622_p8 = por %p621_p7, %p620_p6 }
  0x2f   :  { %p623_p9 = pnand %p622_p8, %p616_p5 }
  0x31   :  { %626 = shalt.err (!%p623_p9)
}
  0x32   :  { %s682_s0 = smov 128   ;;  %s683_s27 = smov 8  }
  0x33   :  { %49 = dma.hbm_to_vmem [thread:$0]  %s820_s3, 2048, %s44_s25, [#allocation6], %s682_s0, %s682_s0, %s683_s27  }
  0x34   :  { %s684_s14 = smov [#allocation8]   ;;  %s627_s18 = scalar_lea.hbm %s822_s5, 2048 }
  0x35   :  { %s57_s15 = sshll.u32 %s684_s14, 4  ;;  %p628_p10 = scmp.ne.s32.totalorder %s822_s5, %s627_s18  ;;  %s58_s15 = int_to_ptr.vmem [resolvable:$true] %s57_s15 }
  0x36   :  { %p631_p11 = scmp.lt.u32.totalorder %s627_s18, %s822_s5 }
  0x38   :  { %p633_p12 = pnand %p631_p11, %p628_p10 }
  0x3a   :  { %636 = shalt.err (!%p633_p12)
}
  0x3b   :  { %s637_s1 = scalar_lea.vmem %s58_s15, 2048  ;;  %p642_p0 = scmp.lt.s32.totalorder %s58_s15, %s58_s15 }
  0x3c   :  { %p638_p13 = scmp.ne.s32.totalorder %s58_s15, %s637_s1  ;;  %p643_p1 = scmp.lt.s32.totalorder %s637_s1, %s637_s1 }
  0x3e   :  { %p644_p2 = por %p643_p1, %p642_p0 }
  0x40   :  { %p645_p3 = pnand %p644_p2, %p638_p13 }
  0x42   :  { %648 = shalt.err (!%p645_p3)
}
  0x43   :  { %63 = dma.hbm_to_vmem [thread:$0]  %s822_s5, 2048, %s58_s15, [#allocation9], %s682_s0, %s682_s0, %s683_s27  }
  0x44   :  { %671 = dma.done.wait [#allocation3], 64  }
  0x45   :  { %672 = vsyncadd [#allocation3], 4294967232 }
  0x46   :  { %673 = dma.done.wait [#allocation6], 2176  }
  0x47   :  { %674 = vsyncadd [#allocation6], 4294965120 }
  0x48   :  { %675 = dma.done.wait [#allocation9], 2048  }
  0x49   :  { %676 = vsyncadd [#allocation9], 4294965248  ;;  %v685_v0 = vmov 0.0   ;;  %vm686_vm0 = vmmov 0   ;;  %v687_v1 = vmov 0.0|0.0   ;;  %vm87_vm1 = vcmask 64512  }
  0x4a   :  { %424 = vmatprep.subr.mxu0 %v685_v0  ;;  %426 = vmatprep.mubr.msk.f32.mxu0 %vm686_vm0, %v685_v0  ;;  %v79_v2 = vld [vmem:[#allocation5] sm:$0xff]  ;;  %v78_v3 = vld [vmem:[#allocation2] sm:$0xf]  ;;  %v162_v4 = vld [vmem:[#allocation7] sm:$0xff]  ;;  %v350_v62 = vlaneseq  ;;  %vm354_vm3 = vcmask 1043456  }
  0x4b   :  { %499 = vmatprep.subr.bf16.mxu1 %v687_v1  ;;  %461 = vmatprep.mubr.msk.f32.mxu1 %vm686_vm0, %v685_v0  ;;  %v163_v5 = vld [vmem:[#allocation7 + $0x8] sm:$0xff]  ;;  %v164_v6 = vld [vmem:[#allocation7 + $0x10] sm:$0xff]  ;;  %v165_v7 = vld [vmem:[#allocation7 + $0x18] sm:$0xff] }
  0x4c   :  { %425 = vmatpush3.msra.mxu0 %v79_v2  ;;  %v500_v8 = vpack.c.bf16 %v163_v5, %v162_v4  ;;  %v503_v9 = vpack.c.bf16 %v165_v7, %v164_v6  ;;  %v166_v10 = vld [vmem:[#allocation7 + $0x20] sm:$0xff]  ;;  %v167_v11 = vld [vmem:[#allocation7 + $0x28] sm:$0xff]  ;;  %v168_v13 = vld [vmem:[#allocation7 + $0x30] sm:$0xff] }
  0x4d   :  { %427 = vmatmul.mubr.msk.f32.vlgmr.msra.gmra.mrb[0].mxu0 %vm87_vm1, %v78_v3  ;;  %523 = vmatprep.subr.bf16.mxu0 %v687_v1  ;;  %v506_v12 = vpack.c.bf16 %v167_v11, %v166_v10  ;;  %v169_v14 = vld [vmem:[#allocation7 + $0x38] sm:$0xff]  ;;  %v170_v16 = vld [vmem:[#allocation7 + $0x40] sm:$0xff]  ;;  %v171_v17 = vld [vmem:[#allocation7 + $0x48] sm:$0xff] }
  0x4e   :  { %496 = vmatprep.mubr.msk.f32.mxu0 %vm686_vm0, %v685_v0  ;;  %501 = vmatpush3.bf16.msra.mxu1 %v500_v8  ;;  %v509_v15 = vpack.c.bf16 %v169_v14, %v168_v13  ;;  %v512_v18 = vpack.c.bf16 %v171_v17, %v170_v16  ;;  %v172_v19 = vld [vmem:[#allocation7 + $0x50] sm:$0xff]  ;;  %v173_v20 = vld [vmem:[#allocation7 + $0x58] sm:$0xff]  ;;  %v174_v22 = vld [vmem:[#allocation7 + $0x60] sm:$0xff]  ;;  %v351_v0 = vand.u32 127, %v350_v62 }
  0x4f   :  { %502 = vmatprep.subr.bf16.mxu1 %v687_v1  ;;  %v515_v21 = vpack.c.bf16 %v173_v20, %v172_v19  ;;  %v175_v23 = vld [vmem:[#allocation7 + $0x68] sm:$0xff]  ;;  %v176_v25 = vld [vmem:[#allocation7 + $0x70] sm:$0xff]  ;;  %v177_v26 = vld [vmem:[#allocation7 + $0x78] sm:$0xff] }
  0x50   :  { %v518_v24 = vpack.c.bf16 %v175_v23, %v174_v22  ;;  %v521_v27 = vpack.c.bf16 %v177_v26, %v176_v25  ;;  %v256_v28 = vld [vmem:[#allocation8] sm:$0xff]  ;;  %v257_v29 = vld [vmem:[#allocation8 + $0x8] sm:$0xff]  ;;  %v258_v30 = vld [vmem:[#allocation8 + $0x10] sm:$0xff]  ;;  %vm352_vm2 = vcmp.lt.s32.totalorder %v351_v0, 4 }
  0x51   :  { %v524_v31 = vpack.c.bf16 %v257_v29, %v256_v28  ;;  %v259_v32 = vld [vmem:[#allocation8 + $0x18] sm:$0xff]  ;;  %v260_v34 = vld [vmem:[#allocation8 + $0x20] sm:$0xff]  ;;  %v261_v35 = vld [vmem:[#allocation8 + $0x28] sm:$0xff] }
  0x52   :  { %504 = vmatpush3.bf16.msra.mxu1 %v503_v9  ;;  %v527_v33 = vpack.c.bf16 %v259_v32, %v258_v30  ;;  %v530_v36 = vpack.c.bf16 %v261_v35, %v260_v34  ;;  %v262_v37 = vld [vmem:[#allocation8 + $0x30] sm:$0xff]  ;;  %v263_v38 = vld [vmem:[#allocation8 + $0x38] sm:$0xff]  ;;  %v264_v40 = vld [vmem:[#allocation8 + $0x40] sm:$0xff] }
  0x53   :  { %505 = vmatprep.subr.bf16.mxu1 %v687_v1  ;;  %525 = vmatpush3.bf16.msra.mxu0 %v524_v31  ;;  %v533_v39 = vpack.c.bf16 %v263_v38, %v262_v37  ;;  %v265_v41 = vld [vmem:[#allocation8 + $0x48] sm:$0xff]  ;;  %v266_v43 = vld [vmem:[#allocation8 + $0x50] sm:$0xff]  ;;  %v267_v44 = vld [vmem:[#allocation8 + $0x58] sm:$0xff] }
  0x54   :  { %526 = vmatprep.subr.bf16.mxu0 %v687_v1  ;;  %v536_v42 = vpack.c.bf16 %v265_v41, %v264_v40  ;;  %v539_v45 = vpack.c.bf16 %v267_v44, %v266_v43  ;;  %v268_v46 = vld [vmem:[#allocation8 + $0x60] sm:$0xff]  ;;  %v269_v47 = vld [vmem:[#allocation8 + $0x68] sm:$0xff]  ;;  %v384_v49 = vld [vmem:[%s819_s2] ss:$0 sm:$0xff] }
  0x55   :  { %v542_v48 = vpack.c.bf16 %v269_v47, %v268_v46  ;;  %v270_v54 = vld [vmem:[#allocation8 + $0x70] sm:$0xff]  ;;  %v271_v55 = vld [vmem:[#allocation8 + $0x78] sm:$0xff] }
  0x56   :  { %507 = vmatpush3.bf16.msra.mxu1 %v506_v12  ;;  %v545_v56 = vpack.c.bf16 %v271_v55, %v270_v54  ;;  %v386_v57 = vld [vmem:[%s821_s4] ss:$0 sm:$0xff]  ;;  %s688_s4 = smov [#allocation10]  }
  0x57   :  { %508 = vmatprep.subr.bf16.mxu1 %v687_v1  ;;  %528 = vmatpush3.bf16.msra.mxu0 %v527_v33  ;;  %v387_v63 = vld [vmem:[%s823_s6] ss:$0 sm:$0xff]  ;;  %s373_s6 = sshll.u32 %s688_s4, 4  ;;  %s374_s6 = int_to_ptr.vmem [resolvable:$true] %s373_s6 }
  0x58   :  { %529 = vmatprep.subr.bf16.mxu0 %v687_v1  ;;  %s649_s29 = scalar_lea.vmem %s374_s6, 64  ;;  %p654_p5 = scmp.lt.s32.totalorder %s374_s6, %s374_s6 }
  0x59   :  { %p650_p4 = scmp.ne.s32.totalorder %s374_s6, %s649_s29  ;;  %p655_p6 = scmp.lt.s32.totalorder %s649_s29, %s649_s29 }
  0x5a   :  { %510 = vmatpush3.bf16.msra.mxu1 %v509_v15 }
  0x5b   :  { %511 = vmatprep.subr.bf16.mxu1 %v687_v1  ;;  %531 = vmatpush3.bf16.msra.mxu0 %v530_v36  ;;  %p656_p7 = por %p655_p6, %p654_p5 }
  0x5c   :  { %532 = vmatprep.subr.bf16.mxu0 %v687_v1 }
  0x5d   :  { %p657_p8 = pnand %p656_p7, %p650_p4 }
  0x5e   :  { %513 = vmatpush3.bf16.msra.mxu1 %v512_v18 }
  0x5f   :  { %514 = vmatprep.subr.bf16.mxu1 %v687_v1  ;;  %534 = vmatpush3.bf16.msra.mxu0 %v533_v39 }
  0x60   :  { %535 = vmatprep.subr.bf16.mxu0 %v687_v1 }
  0x62   :  { %516 = vmatpush3.bf16.msra.mxu1 %v515_v21 }
  0x63   :  { %517 = vmatprep.subr.bf16.mxu1 %v687_v1  ;;  %537 = vmatpush3.bf16.msra.mxu0 %v536_v42 }
  0x64   :  { %538 = vmatprep.subr.bf16.mxu0 %v687_v1 }
  0x66   :  { %519 = vmatpush3.bf16.msra.mxu1 %v518_v24 }
  0x67   :  { %520 = vmatprep.subr.bf16.mxu1 %v687_v1  ;;  %540 = vmatpush3.bf16.msra.mxu0 %v539_v45 }
  0x68   :  { %541 = vmatprep.subr.bf16.mxu0 %v687_v1 }
  0x6a   :  { %522 = vmatpush3.bf16.msra.mxu1 %v521_v27 }
  0x6b   :  { %543 = vmatpush3.bf16.msra.mxu0 %v542_v48 }
  0x6c   :  { %544 = vmatprep.subr.bf16.mxu0 %v687_v1 }
  0x6f   :  { %546 = vmatpush3.bf16.msra.mxu0 %v545_v56 }
 0x120   :  { %v157_v50 = vpop.f32.mrb[0].mxu0 }
 0x121   :  { %v158_v51 = vadd.f32 %v384_v49, %v157_v50  ;;  %v428_v52 = vpop.f32.mrb[1].mxu0 }
 0x123   :  { %v161_v53 = vmax.f32 %v158_v51, 0.0 }
 0x125   :  { %462 = vmatmul.mubr.f32.vlgmr.msra.gmra.mrb[0].mxu1 %v161_v53 }
 0x1f8   :  { %v251_v58 = vpop.f32.mrb[0].mxu1 }
 0x1f9   :  { %v252_v59 = vadd.f32 %v386_v57, %v251_v58  ;;  %v463_v60 = vpop.f32.mrb[1].mxu1 }
 0x1fb   :  { %v255_v61 = vmax.f32 %v252_v59, 0.0 }
 0x1fd   :  { %497 = vmatmul.mubr.f32.vlgmr.msra.gmra.mrb[2].mxu0 %v255_v61 }
 0x2d0   :  { %v345_v1 = vpop.f32.mrb[2].mxu0 }
 0x2d1   :  { %v346_v2 = vadd.f32 %v387_v63, %v345_v1  ;;  %v498_v3 = vpop.f32.mrb[3].mxu0 }
 0x2d3   :  { %v349_v4 = vmax.f32 %v346_v2, 0.0 }
 0x2d5   :  { %v353_v5 = vsel %vm352_vm2, %v349_v4, -1e+30 }
 0x2d6   :  { %v355_v6 = vsel %vm354_vm3, %v353_v5, -inf }
 0x2d7   :  { %356 = vmax.xlane.f32.xlu0 %v355_v6 }
 0x364   :  { %v357_v7 = vpop.xlane.xlu0 %356 }
 0x365   :  { %v358_v8 = vsub.f32 %v353_v5, %v357_v7 }
 0x367   :  { %v359_v9 = vmul.f32 1.442695, %v358_v8 }
 0x369   :  { %557 = vpow2.f32 %v359_v9 }
 0x373   :  { %v558_v10 = vpop.eup %557 }
 0x374   :  { %v361_v11 = vsel %vm354_vm3, %v558_v10, 0.0 }
 0x375   :  { %362 = vadd.xlane.f32.xlu0 %v361_v11 }
 0x402   :  { %v363_v12 = vpop.xlane.xlu0 %362 }
 0x403   :  { %559 = vrcp.f32 %v363_v12 }
 0x40d   :  { %v560_v13 = vpop.eup %559 }
 0x40e   :  { %v365_v14 = vmul.f32 %v560_v13, %v558_v10 }
 0x410   :  { %366 = vst [vmem:[#allocation10] sm:$0xf] %v365_v14 }
 0x411   :  { %660 = shalt.err (!%p657_p8)
}
 0x412   :  { %s661_s9 = scalar_lea.hbm %s824_s7, 64 }
 0x413   :  { %p662_p9 = scmp.ne.s32.totalorder %s824_s7, %s661_s9  ;;  %p665_p10 = scmp.lt.u32.totalorder %s661_s9, %s824_s7 }
 0x415   :  { %p667_p11 = pnand %p665_p10, %p662_p9 }
 0x417   :  { %670 = shalt.err (!%p667_p11)
}
 0x418   :  { %376 = dma.vmem_to_hbm [thread:$0]  %s374_s6, 64, %s824_s7, [#allocation4]  }
 0x419   :  { %677 = dma.done.wait [#allocation4], 64  }
 0x41a   :  { %678 = vsyncadd [#allocation4], 4294967232 }
 0x41b   :  { %380 = vsyncpa [#allocation3], 1 }
 0x41c   :  { %381 = vsyncpa [#allocation6], 1 }
 0x41d   :  { %382 = vsyncpa [#allocation9], 1 }
 0x41e   :  { %383 = vsyncpa [#allocation4], 1 }

</bundles_post_ra>
